<compile_context>
chip_gen: v5e
topology: v5e:2x2
jax: 0.10.0
libtpu: 0.0.40
codegen_flags: <defaults>
</compile_context>

<pallas_src>
import numpy as np

import jax
import jax.numpy as jnp
from jax.experimental import pallas as pl
from jax.experimental.pallas import tpu as pltpu

# Deterministic stand-ins for cfg.anchor_size / cfg.aspect_ratio.
ANCHOR_SIZES = (32.0, 64.0, 128.0)
ASPECT_RATIOS = (0.5, 1.0, 2.0)

MAX_TILE_ROWS = 128  # row-tile size for large levels (v7x megacore / VMEM)


# --------------------------------------------------------------------------
# Anchor templates (trace-time constants).  Mirrors set_cell_anchors().
# --------------------------------------------------------------------------
def set_cell_anchors(anchor_sizes, aspect_ratios):
    ar = np.asarray(aspect_ratios, np.float32)
    h_ratios = np.sqrt(ar).reshape(-1, 1)
    w_ratios = (1.0 / h_ratios).reshape(-1, 1).astype(np.float32)
    ratios = np.concatenate([-w_ratios, -h_ratios, w_ratios, h_ratios], axis=1)
    # np.round and torch.round both round-half-to-even.
    return [np.round(np.float32(s) * ratios / 2.0).astype(np.float32)
            for s in anchor_sizes]


def _round_up(x, m):
    return ((x + m - 1) // m) * m


# --------------------------------------------------------------------------
# Per-level lane-constant table (trace-time numpy).
#
# For lane j = x * (A*4) + a*4 + k of this level:
#   row 0: cell_anchor[a, k] + x * stride_w   (k even, an x coordinate)
#          cell_anchor[a, k]                  (k odd,  a y coordinate)
#   row 1: stride_h if k odd else 0.0
# so that  out[y, j] = row0[j] + y * row1[j]  reproduces shift + cell_anchor
# in PyTorch's exact flat (gh*gw*A, 4) row-major order.
# --------------------------------------------------------------------------
def _build_lane_table(grid_size, stride, cell_anchor):
    gh, gw = int(grid_size[0]), int(grid_size[1])
    sh, sw = int(stride[0]), int(stride[1])
    a4 = cell_anchor.shape[0] * 4
    w = gw * a4
    w_pad = _round_up(w, 128)

    j = np.arange(w)
    x_idx = j // a4
    a = (j % a4) // 4
    k = j % 4
    is_x = (k % 2 == 0)

    lane = np.zeros((2, w_pad), np.float32)
    lane[0, :w] = cell_anchor[a, k] + np.where(
        is_x, (x_idx * sw).astype(np.float32), np.float32(0.0))
    lane[1, :w] = np.where(is_x, np.float32(0.0), np.float32(sh))
    return lane, gh, gw, a4, w, w_pad


# --------------------------------------------------------------------------
# Pallas kernel: one grid step == one row tile of one FPN level.
#   out[y, :] = base_row + y * stride_row        (3 VPU ops per vreg)
# All lane-varying structure (anchor template, x shift, stride_h on y lanes)
# is a trace-time constant (2, w_pad) table; the kernel only supplies the
# row (y) iota.  Every store is a full-width unmasked vst.
# --------------------------------------------------------------------------
def _anchors_level_kernel(lane_ref, out_ref):
    t_rows, w_pad = out_ref.shape
    row0 = pl.program_id(0) * t_rows
    base = lane_ref[0:1, :]        # (1, w_pad): anchor template + x*stride_w
    yrow = lane_ref[1:2, :]        # (1, w_pad): stride_h on y lanes, 0 on x
    rows = jax.lax.broadcasted_iota(jnp.int32, (t_rows, w_pad), 0) + row0
    out_ref[...] = rows.astype(jnp.float32) * yrow + base


def _generate_level_anchors(grid_size, stride, cell_anchor):
    lane, gh, gw, a4, w, w_pad = _build_lane_table(grid_size, stride,
                                                   cell_anchor)
    tile_rows = gh if gh <= MAX_TILE_ROWS else MAX_TILE_ROWS
    grid = (pl.cdiv(gh, tile_rows),)

    out = pl.pallas_call(
        _anchors_level_kernel,
        out_shape=jax.ShapeDtypeStruct((gh, w_pad), jnp.float32),
        grid=grid,
        in_specs=[pl.BlockSpec((2, w_pad), lambda r: (0, 0))],
        out_specs=pl.BlockSpec((tile_rows, w_pad), lambda r: (r, 0)),
        compiler_params=pltpu.CompilerParams(
            dimension_semantics=("parallel",)),
    )(jnp.asarray(lane))

    if w_pad != w:
        # Only the (small) non-128-aligned levels pay this tiny slice.
        out = out[:, :w]
    # Row-major reshape already matches PyTorch's (gh*gw*A, 4) order.
    return out.reshape(gh * gw * (a4 // 4), 4)


def generate_anchors_pallas(grid_sizes, strides, cell_anchors):
    assert len(grid_sizes) == len(strides) == len(cell_anchors), (
        "number of feature-map levels must match number of anchor templates")
    assert all(ca.shape == cell_anchors[0].shape for ca in cell_anchors), (
        "all cell_anchors must have the same anchor count")
    per_level = [
        _generate_level_anchors(g, s, c)
        for g, s, c in zip(grid_sizes, strides, cell_anchors)
    ]
    return jnp.concatenate(per_level, axis=0)


# --------------------------------------------------------------------------
# Forward pass (mirrors AnchorsGenerator.forward).
# --------------------------------------------------------------------------
def anchors_generator_forward(imgs, feature_maps):
    img_h, img_w = imgs.shape[-2:]
    grid_sizes = [tuple(int(d) for d in f.shape[-2:]) for f in feature_maps]
    strides = [(int(img_h // g[0]), int(img_w // g[1])) for g in grid_sizes]
    cell_anchors = set_cell_anchors(ANCHOR_SIZES, ASPECT_RATIOS)

    anchors_per_image = generate_anchors_pallas(grid_sizes, strides,
                                                cell_anchors)
    # List of identical per-image anchor sets (Python-level glue, as in torch).
    return [anchors_per_image] * imgs.shape[0]


# --------------------------------------------------------------------------
# Pure-JAX reference for correctness checking.
# --------------------------------------------------------------------------
def _grid_anchors_ref(grid_size, stride, cell_anchor):
    gh, gw = grid_size
    sh, sw = stride
    sx = jnp.arange(gw, dtype=jnp.int32) * sw
    sy = jnp.arange(gh, dtype=jnp.int32) * sh
    ys, xs = jnp.meshgrid(sy, sx, indexing="ij")
    xs = xs.reshape(-1)
    ys = ys.reshape(-1)
    shifts = jnp.stack([xs, ys, xs, ys], axis=1).astype(jnp.float32)
    ca = jnp.asarray(cell_anchor, jnp.float32)
    return (shifts.reshape(-1, 1, 4) + ca.reshape(1, -1, 4)).reshape(-1, 4)


def _forward_ref(imgs, feature_maps):
    img_h, img_w = imgs.shape[-2:]
    grid_sizes = [tuple(int(d) for d in f.shape[-2:]) for f in feature_maps]
    strides = [(int(img_h // g[0]), int(img_w // g[1])) for g in grid_sizes]
    cell_anchors = set_cell_anchors(ANCHOR_SIZES, ASPECT_RATIOS)
    per_level = [
        _grid_anchors_ref(g, s, c)
        for g, s, c in zip(grid_sizes, strides, cell_anchors)
    ]
    return jnp.concatenate(per_level, axis=0)


if __name__ == "__main__":
    key = jax.random.PRNGKey(0)
    k0, k1, k2, k3 = jax.random.split(key, 4)

    # Small deterministic inputs: batch=2, 64x64 image, 3 FPN-like levels.
    imgs = jax.random.normal(k0, (2, 3, 64, 64), dtype=jnp.float32)
    feature_maps = [
        jax.random.normal(k1, (2, 4, 16, 16), dtype=jnp.float32),
        jax.random.normal(k2, (2, 4, 8, 8), dtype=jnp.float32),
        jax.random.normal(k3, (2, 4, 4, 4), dtype=jnp.float32),
    ]

    anchors = anchors_generator_forward(imgs, feature_maps)
    anchors = [jax.block_until_ready(a) for a in anchors]

    ref = jax.block_until_ready(_forward_ref(imgs, feature_maps))

    assert len(anchors) == imgs.shape[0]
    expected_rows = sum(
        f.shape[-2] * f.shape[-1] * len(ASPECT_RATIOS) for f in feature_maps
    )
    for a in anchors:
        assert a.shape == (expected_rows, 4), a.shape
        assert a.dtype == jnp.float32
        assert jnp.allclose(a, ref, atol=0.0, rtol=0.0)

    print("KERNEL_OK")
</pallas_src>

<mosaic_0001>
module attributes {stable_mosaic.version = 11 : i64} {
  func.func @_anchors_level_kernel(%arg0: i32, %arg1: memref<2x256xf32, #tpu.memory_space<vmem>>, %arg2: memref<16x256xf32, #tpu.memory_space<vmem>>) attributes {dimension_semantics = [#tpu.dimension_semantics<parallel>], iteration_bounds = array<i64: 1>, scalar_prefetch = 0 : i64, scratch_operands = 0 : i64, tpu.core_type = #tpu.core_type<tc>, window_params = [{pipeline_mode = #tpu.pipeline_mode<synchronous>, transform_indices = @transform_0, window_bounds = array<i64: 2, 256>}, {transform_indices = @transform_1, window_bounds = array<i64: 16, 256>}]} {
    %c16_i32 = arith.constant 16 : i32
    %0 = arith.muli %arg0, %c16_i32 : i32
    %c0 = arith.constant 0 : index
    %c0_0 = arith.constant 0 : index
    %1 = vector.load %arg1[%c0, %c0_0] : memref<2x256xf32, #tpu.memory_space<vmem>>, vector<1x256xf32>
    %c1 = arith.constant 1 : index
    %c0_1 = arith.constant 0 : index
    %2 = vector.load %arg1[%c1, %c0_1] : memref<2x256xf32, #tpu.memory_space<vmem>>, vector<1x256xf32>
    %3 = tpu.iota {dimensions = array<i32: 0>} : vector<16x256xi32>
    %4 = vector.broadcast %0 : i32 to vector<16x256xi32>
    %5 = arith.addi %3, %4 : vector<16x256xi32>
    %6 = arith.sitofp %5 : vector<16x256xi32> to vector<16x256xf32>
    %7 = vector.broadcast %2 : vector<1x256xf32> to vector<16x256xf32>
    %8 = arith.mulf %6, %7 : vector<16x256xf32>
    %9 = vector.broadcast %1 : vector<1x256xf32> to vector<16x256xf32>
    %10 = arith.addf %8, %9 : vector<16x256xf32>
    %c0_2 = arith.constant 0 : index
    %c0_3 = arith.constant 0 : index
    %11 = vector.load %arg2[%c0_2, %c0_3] : memref<16x256xf32, #tpu.memory_space<vmem>>, vector<16x256xf32>
    tpu.vector_store %arg2[%c0_2, %c0_3], %10 {strides = array<i32>} : memref<16x256xf32, #tpu.memory_space<vmem>>, vector<16x256xf32>,
    return
  }
  func.func @transform_0(%arg0: i32) -> (i32, i32) {
    %c0_i32 = arith.constant 0 : i32
    %c0_i32_0 = arith.constant 0 : i32
    %c0_i32_1 = arith.constant 0 : i32
    return %c0_i32, %c0_i32_0 : i32, i32
  }
  func.func @transform_1(%arg0: i32) -> (i32, i32) {
    %c0_i32 = arith.constant 0 : i32
    %c0_i32_0 = arith.constant 0 : i32
    return %arg0, %c0_i32 : i32, i32
  }
}

</mosaic_0001>

<bundles_post_ra>
// kernel: tpu_custom_call.1
= control target key start
LH: loop header
LB: loop body
LE: loop exit
PB: predicated region body
PF: predicated region fallthrough
CT: control target
= control target key end

     0   :  { %6 = vsyncpa [#allocation3], 0  ;;  %s152_s0 = inlined_call_operand.hbm [shape: f32[2,256], index: 0, kind: input, shape index: {}]   ;;  %s153_s1 = inlined_call_operand.hbm [shape: f32[16,256], index: 1, kind: output, shape index: {}]  }
   0x1   :  { %7 = vsyncpa [#allocation4], 0  ;;  %s13_s8 = sshll.u32 %s152_s0, 4  ;;  %s132_s9 = smov [#allocation2]   ;;  %s14_s8 = int_to_ptr.hbm [resolvable:$true] %s13_s8 }
   0x2   :  { %s15_s10 = sshll.u32 %s132_s9, 4  ;;  %s16_s10 = int_to_ptr.vmem [resolvable:$true] %s15_s10 }
   0x3   :  { %18 = dma.hbm_to_vmem [thread:$0]  %s14_s8, 64, %s16_s10, [#allocation3]  }
   0x4   :  { %128 = dma.done.wait [#allocation3], 64  }
   0x5   :  { %129 = vsyncadd [#allocation3], 4294967232  ;;  %v27_v0 = vlaneseq  ;;  %v24_v5 = vld [vmem:[#allocation2] ss:$2 sm:$0x3]  ;;  %s133_s0 = smov [#allocation5]  }
   0x6   :  { %v26_v6 = vld [vmem:[#allocation2 + $0x1] ss:$2 sm:$0x3]  ;;  %v45_v8 = vperm.slane %v24_v5, 0  ;;  %v46_v10 = vperm.slane %v24_v5, 1  ;;  %s61_s11 = sshll.u32 %s133_s0, 4  ;;  %s62_s11 = int_to_ptr.vmem [resolvable:$true] %s61_s11 }
   0x7   :  { %v28_v1 = vshrl.u32 %v27_v0, 7  ;;  %v36_v7 = vperm.slane %v26_v6, 0  ;;  %v37_v9 = vperm.slane %v26_v6, 1  ;;  %s63_s14 = sshll.u32 %s153_s1, 4  ;;  %s134_s15 = smov 256   ;;  %s64_s14 = int_to_ptr.hbm [resolvable:$true] %s63_s14 }
   0x8   :  { %s135_s16 = smov 16  }
   0x9   :  { %v29_v2 = vadd.s32 8, %v28_v1  ;;  %v33_v3 = vcvt.s32.f32 %v28_v1 }
   0xb   :  { %v34_v4 = vcvt.s32.f32 %v29_v2  ;;  %v40_v11 = vmul.f32 %v36_v7, %v33_v3  ;;  %v41_v12 = vmul.f32 %v37_v9, %v33_v3 }
   0xd   :  { %v42_v13 = vmul.f32 %v36_v7, %v34_v4  ;;  %v43_v14 = vmul.f32 %v37_v9, %v34_v4  ;;  %v49_v15 = vadd.f32 %v45_v8, %v40_v11  ;;  %v50_v16 = vadd.f32 %v46_v10, %v41_v12 }
   0xf   :  { %v51_v17 = vadd.f32 %v45_v8, %v42_v13  ;;  %v52_v18 = vadd.f32 %v46_v10, %v43_v14  ;;  %53 = vst [vmem:[#allocation5] sm:$0xff] %v49_v15 }
  0x10   :  { %54 = vst [vmem:[#allocation5 + $0x8] sm:$0xff] %v50_v16 }
  0x11   :  { %55 = vst [vmem:[#allocation5 + $0x10] sm:$0xff] %v51_v17 }
  0x12   :  { %56 = vst [vmem:[#allocation5 + $0x18] sm:$0xff] %v52_v18 }
  0x13   :  { %69 = dma.vmem_to_hbm [thread:$0]  %s62_s11, 512, %s64_s14, [#allocation4], %s134_s15, %s134_s15, %s135_s16  }
  0x14   :  { %130 = dma.done.wait [#allocation4], 512  }
  0x15   :  { %131 = vsyncadd [#allocation4], 4294966784 }
  0x16   :  { %74 = vsyncpa [#allocation3], 1 }
  0x17   :  { %75 = vsyncpa [#allocation4], 1 }

</bundles_post_ra>
